<compile_context>
chip_gen: v5e
topology: v5e:2x2
jax: 0.10.0
libtpu: 0.0.40
codegen_flags: <defaults>
</compile_context>

<pallas_src>
import numpy as np
import jax
import jax.numpy as jnp
from jax import lax
from jax.experimental import pallas as pl
from jax.experimental.pallas import tpu as pltpu


LANE = 128  # TPU lane width; fc_3 output padded to this for unmasked stores


# -----------------------------------------------------------------------------
# Fused Pallas kernel: entire 3-layer MLP forward, fully VMEM-resident
# -----------------------------------------------------------------------------
def mlp_kernel(x_ref, w1_ref, b1_ref, w2_ref, b2_ref, w3_ref, b3_ref, o_ref):
    # In-kernel bf16 cast of the f32 input (a few VPU cycles, hides under the
    # w1 DMA). All matmuls accumulate in f32 on the MXU; biases added in f32.
    x = x_ref[...].astype(jnp.bfloat16)

    # fc_1 + ReLU
    h = jnp.dot(x, w1_ref[...], preferred_element_type=jnp.float32)
    h = jnp.maximum(h + b1_ref[...], 0.0)

    # fc_2 + ReLU
    h = jnp.dot(h.astype(jnp.bfloat16), w2_ref[...], preferred_element_type=jnp.float32)
    h = jnp.maximum(h + b2_ref[...], 0.0)

    # fc_3 (logits, lane-padded to 128 columns -> unmasked lane-dense store)
    o_ref[...] = (
        jnp.dot(h.astype(jnp.bfloat16), w3_ref[...], preferred_element_type=jnp.float32)
        + b3_ref[...]
    )


# -----------------------------------------------------------------------------
# pallas_call wrapper (ungridded, all operands pinned to VMEM)
# -----------------------------------------------------------------------------
def mlp_forward(x, params, num_classes=10):
    """x: (N, C, H, W) float32. Weights bf16 (in, out); biases f32 (1, out).
    w3/b3 are pre-padded to 128 output lanes in `params` (keys w3_pad/b3_pad)."""
    N = x.shape[0]
    D = int(np.prod(x.shape[1:]))
    xf = x.reshape(N, D)  # metadata-only flatten, same order as torch .view(N, -1)

    w1, b1 = params["w1"], params["b1"]
    w2, b2 = params["w2"], params["b2"]
    w3p, b3p = params["w3_pad"], params["b3_pad"]
    H1, H2 = w1.shape[1], w2.shape[1]

    vmem_spec = pl.BlockSpec(memory_space=pltpu.MemorySpace.VMEM)

    flops = 2 * N * (D * H1 + H1 * H2 + H2 * LANE)
    bytes_accessed = (
        xf.size * 4
        + w1.size * 2 + b1.size * 4
        + w2.size * 2 + b2.size * 4
        + w3p.size * 2 + b3p.size * 4
        + N * LANE * 4
    )

    out = pl.pallas_call(
        mlp_kernel,
        out_shape=jax.ShapeDtypeStruct((N, LANE), jnp.float32),
        in_specs=[vmem_spec] * 7,
        out_specs=vmem_spec,
        cost_estimate=pl.CostEstimate(
            flops=flops, transcendentals=0, bytes_accessed=bytes_accessed
        ),
    )(xf, w1, b1, w2, b2, w3p, b3p)

    return out[:, :num_classes]


# -----------------------------------------------------------------------------
# Parameter init (PyTorch nn.Linear-style uniform) and pure-JAX f32 reference
# -----------------------------------------------------------------------------
def init_params(key, in_dim, hidden=128, num_classes=10):
    ks = jax.random.split(key, 6)

    def lin(kw, kb, fan_in, fan_out):
        bound = 1.0 / np.sqrt(fan_in)
        w = jax.random.uniform(kw, (fan_in, fan_out), jnp.float32, -bound, bound)
        b = jax.random.uniform(kb, (1, fan_out), jnp.float32, -bound, bound)
        return w, b

    w1, b1 = lin(ks[0], ks[1], in_dim, hidden)
    w2, b2 = lin(ks[2], ks[3], hidden, hidden)
    w3, b3 = lin(ks[4], ks[5], hidden, num_classes)
    return {"w1": w1, "b1": b1, "w2": w2, "b2": b2, "w3": w3, "b3": b3}


def make_kernel_params(p_f32, num_classes=10):
    """bf16 weights, f32 biases; fc_3 weight/bias zero-padded to 128 lanes ONCE."""
    hidden = p_f32["w3"].shape[0]
    w3_pad = jnp.zeros((hidden, LANE), jnp.float32).at[:, :num_classes].set(p_f32["w3"])
    b3_pad = jnp.zeros((1, LANE), jnp.float32).at[:, :num_classes].set(p_f32["b3"])
    return {
        "w1": p_f32["w1"].astype(jnp.bfloat16), "b1": p_f32["b1"],
        "w2": p_f32["w2"].astype(jnp.bfloat16), "b2": p_f32["b2"],
        "w3_pad": w3_pad.astype(jnp.bfloat16), "b3_pad": b3_pad,
    }


def ref_forward(x, p):
    """Mirrors MLP.forward: flatten -> fc1 -> relu -> fc2 -> relu -> fc3."""
    N = x.shape[0]
    h = x.reshape(N, -1)
    h = jnp.maximum(jnp.dot(h, p["w1"], precision=lax.Precision.HIGHEST) + p["b1"], 0.0)
    h = jnp.maximum(jnp.dot(h, p["w2"], precision=lax.Precision.HIGHEST) + p["b2"], 0.0)
    return jnp.dot(h, p["w3"], precision=lax.Precision.HIGHEST) + p["b3"]


if __name__ == "__main__":
    # Shapes from the module: img_dim=(1, 28, 28), hidden=128, num_classes=10, batch=2.
    batch, C, H, W = 2, 1, 28, 28
    hidden, num_classes = 128, 10

    key = jax.random.PRNGKey(0)
    key, kx = jax.random.split(key)
    x = jax.random.normal(kx, (batch, C, H, W), jnp.float32)

    params_f32 = init_params(key, C * H * W, hidden, num_classes)
    params_kernel = make_kernel_params(params_f32, num_classes)

    logits = jax.block_until_ready(mlp_forward(x, params_kernel, num_classes))

    ref = ref_forward(x, params_f32)
    np.testing.assert_allclose(np.asarray(logits), np.asarray(ref), rtol=5e-2, atol=5e-2)

    # TODO(synk): MLP.pred (softmax over logits) is not part of forward(); trivially
    # doable in-kernel with jnp.exp / pl.reciprocal if ever needed.
    print("KERNEL_OK")
</pallas_src>

<mosaic_0001>
module attributes {stable_mosaic.version = 11 : i64} {
  func.func @mlp_kernel(%arg0: memref<2x784xf32, #tpu.memory_space<vmem>>, %arg1: memref<784x128xbf16, #tpu.memory_space<vmem>>, %arg2: memref<1x128xf32, #tpu.memory_space<vmem>>, %arg3: memref<128x128xbf16, #tpu.memory_space<vmem>>, %arg4: memref<1x128xf32, #tpu.memory_space<vmem>>, %arg5: memref<128x128xbf16, #tpu.memory_space<vmem>>, %arg6: memref<1x128xf32, #tpu.memory_space<vmem>>, %arg7: memref<2x128xf32, #tpu.memory_space<vmem>>) attributes {dimension_semantics = [], scalar_prefetch = 0 : i64, scratch_operands = 0 : i64, tpu.core_type = #tpu.core_type<tc>} {
    %c0 = arith.constant 0 : index
    %c0_0 = arith.constant 0 : index
    %0 = vector.load %arg0[%c0, %c0_0] : memref<2x784xf32, #tpu.memory_space<vmem>>, vector<2x784xf32>
    %1 = arith.truncf %0 : vector<2x784xf32> to vector<2x784xbf16>
    %c0_1 = arith.constant 0 : index
    %c0_2 = arith.constant 0 : index
    %2 = vector.load %arg1[%c0_1, %c0_2] : memref<784x128xbf16, #tpu.memory_space<vmem>>, vector<784x128xbf16>
    %cst = arith.constant dense<0.000000e+00> : vector<2x128xf32>
    %3 = tpu.matmul %1, %2, %cst {dimension_numbers = #tpu.dot_dimension_numbers<[1], [0], [0], [1], [0, 0, 1, 1], [], []>} : vector<2x784xbf16>, vector<784x128xbf16>, vector<2x128xf32> -> vector<2x128xf32>
    %c0_3 = arith.constant 0 : index
    %c0_4 = arith.constant 0 : index
    %4 = vector.load %arg2[%c0_3, %c0_4] : memref<1x128xf32, #tpu.memory_space<vmem>>, vector<1x128xf32>
    %5 = vector.broadcast %4 : vector<1x128xf32> to vector<2x128xf32>
    %6 = arith.addf %3, %5 : vector<2x128xf32>
    %cst_5 = arith.constant 0.000000e+00 : f32
    %7 = vector.broadcast %cst_5 : f32 to vector<2x128xf32>
    %8 = arith.maximumf %6, %7 : vector<2x128xf32>
    %9 = arith.truncf %8 : vector<2x128xf32> to vector<2x128xbf16>
    %c0_6 = arith.constant 0 : index
    %c0_7 = arith.constant 0 : index
    %10 = vector.load %arg3[%c0_6, %c0_7] : memref<128x128xbf16, #tpu.memory_space<vmem>>, vector<128x128xbf16>
    %cst_8 = arith.constant dense<0.000000e+00> : vector<2x128xf32>
    %11 = tpu.matmul %9, %10, %cst_8 {dimension_numbers = #tpu.dot_dimension_numbers<[1], [0], [0], [1], [0, 0, 1, 1], [], []>} : vector<2x128xbf16>, vector<128x128xbf16>, vector<2x128xf32> -> vector<2x128xf32>
    %c0_9 = arith.constant 0 : index
    %c0_10 = arith.constant 0 : index
    %12 = vector.load %arg4[%c0_9, %c0_10] : memref<1x128xf32, #tpu.memory_space<vmem>>, vector<1x128xf32>
    %13 = vector.broadcast %12 : vector<1x128xf32> to vector<2x128xf32>
    %14 = arith.addf %11, %13 : vector<2x128xf32>
    %cst_11 = arith.constant 0.000000e+00 : f32
    %15 = vector.broadcast %cst_11 : f32 to vector<2x128xf32>
    %16 = arith.maximumf %14, %15 : vector<2x128xf32>
    %17 = arith.truncf %16 : vector<2x128xf32> to vector<2x128xbf16>
    %c0_12 = arith.constant 0 : index
    %c0_13 = arith.constant 0 : index
    %18 = vector.load %arg5[%c0_12, %c0_13] : memref<128x128xbf16, #tpu.memory_space<vmem>>, vector<128x128xbf16>
    %cst_14 = arith.constant dense<0.000000e+00> : vector<2x128xf32>
    %19 = tpu.matmul %17, %18, %cst_14 {dimension_numbers = #tpu.dot_dimension_numbers<[1], [0], [0], [1], [0, 0, 1, 1], [], []>} : vector<2x128xbf16>, vector<128x128xbf16>, vector<2x128xf32> -> vector<2x128xf32>
    %c0_15 = arith.constant 0 : index
    %c0_16 = arith.constant 0 : index
    %20 = vector.load %arg6[%c0_15, %c0_16] : memref<1x128xf32, #tpu.memory_space<vmem>>, vector<1x128xf32>
    %21 = vector.broadcast %20 : vector<1x128xf32> to vector<2x128xf32>
    %22 = arith.addf %19, %21 : vector<2x128xf32>
    %c0_17 = arith.constant 0 : index
    %c0_18 = arith.constant 0 : index
    %23 = vector.load %arg7[%c0_17, %c0_18] : memref<2x128xf32, #tpu.memory_space<vmem>>, vector<2x128xf32>
    tpu.vector_store %arg7[%c0_17, %c0_18], %22 {strides = array<i32>} : memref<2x128xf32, #tpu.memory_space<vmem>>, vector<2x128xf32>,
    return
  }
}

</mosaic_0001>

<bundles_post_ra>
// kernel: tpu_custom_call.1
= control target key start
LH: loop header
LB: loop body
LE: loop exit
PB: predicated region body
PF: predicated region fallthrough
CT: control target
= control target key end

     0   :  { %12 = vsyncpa [#allocation3], 0  ;;  %s1329_s0 = inlined_call_operand.hbm [shape: f32[2,784], index: 0, kind: input, shape index: {}]   ;;  %s1330_s1 = inlined_call_operand.hbm [shape: bf16[784,128], index: 1, kind: input, shape index: {}]   ;;  %s1331_s2 = inlined_call_operand.vmem [shape: f32[1,128], index: 2, kind: input, shape index: {}]   ;;  %s1332_s3 = inlined_call_operand.hbm [shape: bf16[128,128], index: 3, kind: input, shape index: {}]   ;;  %s1333_s4 = inlined_call_operand.vmem [shape: f32[1,128], index: 4, kind: input, shape index: {}]   ;;  %s1334_s5 = inlined_call_operand.hbm [shape: bf16[128,128], index: 5, kind: input, shape index: {}]   ;;  %s1335_s6 = inlined_call_operand.vmem [shape: f32[1,128], index: 6, kind: input, shape index: {}]   ;;  %s1336_s7 = inlined_call_operand.hbm [shape: f32[2,128], index: 7, kind: output, shape index: {}]  }
   0x1   :  { %13 = vsyncpa [#allocation6], 0 }
   0x2   :  { %14 = vsyncpa [#allocation9], 0  ;;  %s31_s26 = sshll.u32 %s1330_s1, 4  ;;  %s32_s26 = int_to_ptr.hbm [resolvable:$true] %s31_s26 }
   0x3   :  { %15 = vsyncpa [#allocation4], 0  ;;  %s1258_s27 = smov [#allocation5]   ;;  %s21_s8 = sshll.u32 %s1329_s0, 4  ;;  %s22_s8 = int_to_ptr.hbm [resolvable:$true] %s21_s8 }
   0x4   :  { %s33_s28 = sshll.u32 %s1258_s27, 4  ;;  %s1259_s9 = smov 64   ;;  %s34_s28 = int_to_ptr.vmem [resolvable:$true] %s33_s28 }
   0x5   :  { %s1260_s10 = smov 4   ;;  %s1261_s11 = smov [#allocation2]  }
   0x6   :  { %39 = dma.hbm_to_vmem [thread:$0]  %s32_s26, 6272, %s34_s28, [#allocation6], %s1259_s9, %s1259_s9, %s1260_s10  }
   0x7   :  { %s23_s12 = sshll.u32 %s1261_s11, 4  ;;  %s46_s15 = sshll.u32 %s1332_s3, 4  ;;  %s24_s12 = int_to_ptr.vmem [resolvable:$true] %s23_s12  ;;  %s47_s15 = int_to_ptr.hbm [resolvable:$true] %s46_s15 }
   0x8   :  { %26 = dma.hbm_to_vmem [thread:$0]  %s22_s8, 224, %s24_s12, [#allocation3]  }
   0x9   :  { %s61_s17 = sshll.u32 %s1334_s5, 4  ;;  %s1262_s18 = smov [#allocation7]   ;;  %s62_s17 = int_to_ptr.hbm [resolvable:$true] %s61_s17 }
   0xa   :  { %s48_s19 = sshll.u32 %s1262_s18, 4  ;;  %s1263_s0 = smov [#allocation8]   ;;  %s49_s19 = int_to_ptr.vmem [resolvable:$true] %s48_s19 }
   0xb   :  { %54 = dma.hbm_to_vmem [thread:$0]  %s47_s15, 1024, %s49_s19, [#allocation6], %s1259_s9, %s1259_s9, %s1260_s10  }
   0xc   :  { %s63_s20 = sshll.u32 %s1263_s0, 4  ;;  %s64_s20 = int_to_ptr.vmem [resolvable:$true] %s63_s20 }
   0xd   :  { %69 = dma.hbm_to_vmem [thread:$0]  %s62_s17, 1024, %s64_s20, [#allocation9], %s1259_s9, %s1259_s9, %s1260_s10  }
   0xe   :  { %1250 = dma.done.wait [#allocation3], 224  }
   0xf   :  { %1251 = vsyncadd [#allocation3], 4294967072 }
  0x10   :  { %1252 = dma.done.wait [#allocation6], 7296  }
  0x11   :  { %1253 = vsyncadd [#allocation6], 4294960000 }
  0x12   :  { %1254 = dma.done.wait [#allocation9], 1024  }
  0x13   :  { %1255 = vsyncadd [#allocation9], 4294966272  ;;  %v1062_v0 = vld [vmem:[#allocation5 + $0x38] sm:$0xff]  ;;  %v1061_v3 = vld [vmem:[#allocation5 + $0x30] sm:$0xff]  ;;  %vm513_vm0 = vcmask 130048   ;;  %s1264_s24 = smov [#allocation10]  }
  0x14   :  { %v1070_v1 = vld [vmem:[#allocation5 + $0x78] sm:$0xff]  ;;  %517 = vmatpush.bf16.msra.mxu0 %v1062_v0  ;;  %v1069_v4 = vld [vmem:[#allocation5 + $0x70] sm:$0xff]  ;;  %v1060_v8 = vld [vmem:[#allocation5 + $0x28] sm:$0xff]  ;;  %s780_s25 = sshll.u32 %s1264_s24, 4  ;;  %s782_s28 = sshll.u32 %s1336_s7, 4  ;;  %s781_s25 = int_to_ptr.vmem [resolvable:$true] %s780_s25  ;;  %s783_s28 = int_to_ptr.hbm [resolvable:$true] %s782_s28 }
  0x15   :  { %v1078_v2 = vld [vmem:[#allocation5 + $0xb8] sm:$0xff]  ;;  %530 = vmatpush.bf16.msra.mxu1 %v1070_v1  ;;  %v1077_v5 = vld [vmem:[#allocation5 + $0xb0] sm:$0xff]  ;;  %v1068_v9 = vld [vmem:[#allocation5 + $0x68] sm:$0xff] }
  0x16   :  { %543 = vmatpush.bf16.msra.mxu2 %v1078_v2  ;;  %v1086_v6 = vld [vmem:[#allocation5 + $0xf8] sm:$0xff]  ;;  %v1085_v7 = vld [vmem:[#allocation5 + $0xf0] sm:$0xff]  ;;  %v1076_v10 = vld [vmem:[#allocation5 + $0xa8] sm:$0xff] }
  0x17   :  { %556 = vmatpush.bf16.msra.mxu3 %v1086_v6  ;;  %v1084_v11 = vld [vmem:[#allocation5 + $0xe8] sm:$0xff]  ;;  %v1059_v12 = vld [vmem:[#allocation5 + $0x20] sm:$0xff]  ;;  %v89_v15 = vld [vmem:[#allocation2] sm:$0xff] }
  0x18   :  { %518 = vmatpush.bf16.msra.mxu0 %v1061_v3  ;;  %v1067_v13 = vld [vmem:[#allocation5 + $0x60] sm:$0xff]  ;;  %93 = vst [vmem:[#allocation1] ss:$4 sm:$0xff] %v89_v15  ;;  %v1058_v17 = vld [vmem:[#allocation5 + $0x18] sm:$0xff]  ;;  %v1057_v22 = vld [vmem:[#allocation5 + $0x10] sm:$0xff] }
  0x19   :  { %531 = vmatpush.bf16.msra.mxu1 %v1069_v4  ;;  %v1075_v14 = vld [vmem:[#allocation5 + $0xa0] sm:$0xff]  ;;  %v1066_v18 = vld [vmem:[#allocation5 + $0x58] sm:$0xff]  ;;  %v1065_v23 = vld [vmem:[#allocation5 + $0x50] sm:$0xff] }
  0x1a   :  { %544 = vmatpush.bf16.msra.mxu2 %v1077_v5  ;;  %v1083_v16 = vld [vmem:[#allocation5 + $0xe0] sm:$0xff]  ;;  %v90_v19 = vld [vmem:[#allocation2 + $0x8] sm:$0x3f]  ;;  %v1073_v24 = vld [vmem:[#allocation5 + $0x90] sm:$0xff] }
  0x1b   :  { %557 = vmatpush.bf16.msra.mxu3 %v1085_v7  ;;  %v1074_v20 = vld [vmem:[#allocation5 + $0x98] sm:$0xff]  ;;  %95 = vst [vmem:[#allocation1 + $0x20] ss:$4 sm:$0xff] %v90_v19  ;;  %v1081_v25 = vld [vmem:[#allocation5 + $0xd0] sm:$0xff]  ;;  %v1056_v26 = vld [vmem:[#allocation5 + $0x8] sm:$0xff] }
  0x1c   :  { %519 = vmatpush.bf16.msra.mxu0 %v1060_v8  ;;  %v1082_v21 = vld [vmem:[#allocation5 + $0xd8] sm:$0xff]  ;;  %v1064_v27 = vld [vmem:[#allocation5 + $0x48] sm:$0xff]  ;;  %v1055_v29 = vld [vmem:[#allocation5] sm:$0xff] }
  0x1d   :  { %532 = vmatpush.bf16.msra.mxu1 %v1068_v9  ;;  %v1072_v28 = vld [vmem:[#allocation5 + $0x88] sm:$0xff]  ;;  %v1063_v30 = vld [vmem:[#allocation5 + $0x40] sm:$0xff]  ;;  %v1094_v34 = vld [vmem:[#allocation5 + $0x138] sm:$0xff] }
  0x1e   :  { %545 = vmatpush.bf16.msra.mxu2 %v1076_v10  ;;  %v1080_v31 = vld [vmem:[#allocation5 + $0xc8] sm:$0xff]  ;;  %v1102_v35 = vld [vmem:[#allocation5 + $0x178] sm:$0xff]  ;;  %v1071_v36 = vld [vmem:[#allocation5 + $0x80] sm:$0xff] }
  0x1f   :  { %558 = vmatpush.bf16.msra.mxu3 %v1084_v11  ;;  %v96_v32 = vld.sshfl [vmem:[#allocation1] sm:$0xff pattern:$0x73625140]  ;;  %v97_v33 = vld.sshfl [vmem:[#allocation1 + $0x8] sm:$0xff pattern:$0x73625140] }
  0x20   :  { %520 = vmatpush.bf16.msra.mxu0 %v1059_v12  ;;  %v98_v37 = vld.sshfl [vmem:[#allocation1 + $0x10] sm:$0xff pattern:$0x73625140]  ;;  %v110_v38 = vpack.c.bf16 %v96_v32, %v96_v32  ;;  %v111_v39 = vpack.c.bf16 %v97_v33, %v97_v33  ;;  %v99_v42 = vld.sshfl [vmem:[#allocation1 + $0x18] sm:$0xff pattern:$0x73625140] }
  0x21   :  { %533 = vmatpush.bf16.msra.mxu1 %v1067_v13  ;;  %v1079_v40 = vld [vmem:[#allocation5 + $0xc0] sm:$0xff]  ;;  %v1093_v43 = vld [vmem:[#allocation5 + $0x130] sm:$0xff]  ;;  %v112_v45 = vpack.c.bf16 %v98_v37, %v98_v37  ;;  %v113_v46 = vpack.c.bf16 %v99_v42, %v99_v42  ;;  %v1092_v47 = vld [vmem:[#allocation5 + $0x128] sm:$0xff] }
  0x22   :  { %546 = vmatpush.bf16.msra.mxu2 %v1075_v14  ;;  %v1103_v41 = vld [vmem:[#allocation5 + $0x180] sm:$0xff]  ;;  %v1101_v44 = vld [vmem:[#allocation5 + $0x170] sm:$0xff]  ;;  %v1100_v48 = vld [vmem:[#allocation5 + $0x168] sm:$0xff] }
  0x23   :  { %559 = vmatpush.bf16.msra.mxu3 %v1083_v16  ;;  %v1091_v49 = vld [vmem:[#allocation5 + $0x120] sm:$0xff]  ;;  %v1090_v51 = vld [vmem:[#allocation5 + $0x118] sm:$0xff]  ;;  %v1089_v54 = vld [vmem:[#allocation5 + $0x110] sm:$0xff] }
  0x24   :  { %521 = vmatpush.bf16.msra.mxu0 %v1058_v17  ;;  %v1099_v50 = vld [vmem:[#allocation5 + $0x160] sm:$0xff]  ;;  %v1098_v52 = vld [vmem:[#allocation5 + $0x158] sm:$0xff]  ;;  %v1097_v55 = vld [vmem:[#allocation5 + $0x150] sm:$0xff] }
  0x25   :  { %534 = vmatpush.bf16.msra.mxu1 %v1066_v18  ;;  %v102_v53 = vld.sshfl [vmem:[#allocation1 + $0x30] sm:$0xff pattern:$0x73625140]  ;;  %v1088_v57 = vld [vmem:[#allocation5 + $0x108] sm:$0xff]  ;;  %v1109_v3 = vld [vmem:[#allocation7 + $0x28] sm:$0xff] }
  0x26   :  { %547 = vmatpush.bf16.msra.mxu2 %v1074_v20  ;;  %v116_v56 = vpack.c.bf16 %v102_v53, %v102_v53  ;;  %v1096_v58 = vld [vmem:[#allocation5 + $0x148] sm:$0xff]  ;;  %v1087_v59 = vld [vmem:[#allocation5 + $0x100] sm:$0xff]  ;;  %v101_v62 = vld.sshfl [vmem:[#allocation1 + $0x28] sm:$0xff pattern:$0x73625140] }
  0x27   :  { %560 = vmatpush.bf16.msra.mxu3 %v1082_v21  ;;  %v1095_v60 = vld [vmem:[#allocation5 + $0x140] sm:$0xff]  ;;  %v100_v61 = vld.sshfl [vmem:[#allocation1 + $0x20] sm:$0xff pattern:$0x73625140]  ;;  %v115_v0 = vpack.c.bf16 %v101_v62, %v101_v62  ;;  %v1110_v2 = vld [vmem:[#allocation7 + $0x30] sm:$0xff] }
  0x28   :  { %522 = vmatpush.bf16.msra.mxu0 %v1057_v22  ;;  %v114_v63 = vpack.c.bf16 %v100_v61, %v100_v61  ;;  %v1111_v1 = vld [vmem:[#allocation7 + $0x38] sm:$0xff]  ;;  %v1108_v4 = vld [vmem:[#allocation7 + $0x20] sm:$0xff]  ;;  %v1106_v6 = vld [vmem:[#allocation7 + $0x10] sm:$0xff] }
  0x29   :  { %535 = vmatpush.bf16.msra.mxu1 %v1065_v23  ;;  %v1107_v5 = vld [vmem:[#allocation7 + $0x18] sm:$0xff]  ;;  %v1105_v7 = vld [vmem:[#allocation7 + $0x8] sm:$0xff]  ;;  %v1104_v10 = vld [vmem:[#allocation7] sm:$0xff] }
  0x2a   :  { %548 = vmatpush.bf16.msra.mxu2 %v1073_v24  ;;  %v1119_v13 = vld [vmem:[#allocation8 + $0x38] sm:$0xff]  ;;  %v1118_v16 = vld [vmem:[#allocation8 + $0x30] sm:$0xff]  ;;  %v1127_v17 = vld [vmem:[%s1331_s2] ss:$0 sm:$0xff] }
  0x2b   :  { %561 = vmatpush.bf16.msra.mxu3 %v1081_v25  ;;  %v1117_v18 = vld [vmem:[#allocation8 + $0x28] sm:$0xff]  ;;  %v1116_v22 = vld [vmem:[#allocation8 + $0x20] sm:$0xff]  ;;  %v1115_v24 = vld [vmem:[#allocation8 + $0x18] sm:$0xff] }
  0x2c   :  { %523 = vmatpush.bf16.msra.mxu0 %v1056_v26 }
  0x2d   :  { %536 = vmatpush.bf16.msra.mxu1 %v1064_v27  ;;  %v1114_v27 = vld [vmem:[#allocation8 + $0x10] sm:$0xff] }
  0x2e   :  { %549 = vmatpush.bf16.msra.mxu2 %v1072_v28 }
  0x2f   :  { %562 = vmatpush.bf16.msra.mxu3 %v1080_v31 }
  0x30   :  { %524 = vmatpush.bf16.msra.mxu0 %v1055_v29 }
  0x31   :  { %537 = vmatpush.bf16.msra.mxu1 %v1063_v30 }
  0x32   :  { %550 = vmatpush.bf16.msra.mxu2 %v1071_v36 }
  0x33   :  { %525 = vmatmul.bf16.vlgmr.msra.gmra.mxu0 %v110_v38  ;;  %563 = vmatpush.bf16.msra.mxu3 %v1079_v40  ;;  %v1112_v40 = vld [vmem:[#allocation8] sm:$0xff] }
  0x34   :  { %569 = vmatpush.bf16.msrb.mxu0 %v1094_v34  ;;  %538 = vmatmul.bf16.vlgmr.msra.gmra.mxu1 %v111_v39  ;;  %v1113_v39 = vld [vmem:[#allocation8 + $0x8] sm:$0xff] }
  0x35   :  { %582 = vmatpush.bf16.msrb.mxu1 %v1102_v35  ;;  %551 = vmatmul.bf16.vlgmr.msra.gmra.mxu2 %v112_v45 }
  0x36   :  { %602 = vmatpush.bf16.msrb.mxu2 %v1103_v41  ;;  %564 = vmatmul.bf16.vlgmr.msra.gmra.mxu3 %v113_v46  ;;  %v1128_v41 = vld [vmem:[%s1333_s4] ss:$0 sm:$0xff] }
  0x37   :  { %678 = vmatpush.bf16.msrb.mxu3 %v1111_v1 }
  0x38   :  { %570 = vmatpush.bf16.msrb.mxu0 %v1093_v43 }
  0x39   :  { %583 = vmatpush.bf16.msrb.mxu1 %v1101_v44 }
  0x3a   :  { %761 = vmatpush.bf16.msra.mxu2 %v1119_v13 }
  0x3b   :  { %679 = vmatpush.bf16.msrb.mxu3 %v1110_v2 }
  0x3c   :  { %571 = vmatpush.bf16.msrb.mxu0 %v1092_v47  ;;  %v1129_v47 = vld [vmem:[%s1335_s6] ss:$0 sm:$0xff] }
  0x3d   :  { %584 = vmatpush.bf16.msrb.mxu1 %v1100_v48 }
  0x3e   :  { %762 = vmatpush.bf16.msra.mxu2 %v1118_v16 }
  0x3f   :  { %680 = vmatpush.bf16.msrb.mxu3 %v1109_v3 }
  0x40   :  { %572 = vmatpush.bf16.msrb.mxu0 %v1091_v49 }
  0x41   :  { %585 = vmatpush.bf16.msrb.mxu1 %v1099_v50 }
  0x42   :  { %763 = vmatpush.bf16.msra.mxu2 %v1117_v18 }
  0x43   :  { %681 = vmatpush.bf16.msrb.mxu3 %v1108_v4 }
  0x44   :  { %573 = vmatpush.bf16.msrb.mxu0 %v1090_v51 }
  0x45   :  { %586 = vmatpush.bf16.msrb.mxu1 %v1098_v52  ;;  %990 = vmatmul.msk.bf16.vlgmr.msrb.gmra.mxu2 %vm513_vm0, %v116_v56 }
  0x46   :  { %764 = vmatpush.bf16.msra.mxu2 %v1116_v22 }
  0x47   :  { %682 = vmatpush.bf16.msrb.mxu3 %v1107_v5 }
  0x48   :  { %574 = vmatpush.bf16.msrb.mxu0 %v1089_v54 }
  0x49   :  { %587 = vmatpush.bf16.msrb.mxu1 %v1097_v55 }
  0x4a   :  { %765 = vmatpush.bf16.msra.mxu2 %v1115_v24 }
  0x4b   :  { %683 = vmatpush.bf16.msrb.mxu3 %v1106_v6 }
  0x4c   :  { %575 = vmatpush.bf16.msrb.mxu0 %v1088_v57 }
  0x4d   :  { %588 = vmatpush.bf16.msrb.mxu1 %v1096_v58 }
  0x4e   :  { %766 = vmatpush.bf16.msra.mxu2 %v1114_v27 }
  0x4f   :  { %684 = vmatpush.bf16.msrb.mxu3 %v1105_v7 }
  0x50   :  { %576 = vmatpush.bf16.msrb.mxu0 %v1087_v59 }
  0x51   :  { %589 = vmatpush.bf16.msrb.mxu1 %v1095_v60 }
  0x52   :  { %767 = vmatpush.bf16.msra.mxu2 %v1113_v39 }
  0x53   :  { %577 = vmatmul.bf16.vlgmr.msrb.gmra.mxu0 %v114_v63  ;;  %685 = vmatpush.bf16.msrb.mxu3 %v1104_v10 }
  0x54   :  { %590 = vmatmul.bf16.vlgmr.msrb.gmra.mxu1 %v115_v0 }
  0x56   :  { %768 = vmatpush.bf16.msra.mxu2 %v1112_v40 }
  0xb0   :  { %v526_v8 = vpop.f32.mrf.mxu0 }
  0xb1   :  { %v539_v9 = vpop.f32.mrf.mxu1  ;;  %v527_v19 = vadd.f32 %v1127_v17, %v526_v8 }
  0xb3   :  { %v540_v23 = vadd.f32 %v539_v9, %v527_v19 }
  0xb8   :  { %v528_v11 = vpop.f32.mrf.mxu0  ;;  %v552_v14 = vpop.f32.mrf.mxu2 }
  0xb9   :  { %v541_v12 = vpop.f32.mrf.mxu1  ;;  %v565_v15 = vpop.f32.mrf.mxu3  ;;  %v553_v25 = vadd.f32 %v552_v14, %v540_v23 }
  0xbb   :  { %v566_v28 = vadd.f32 %v565_v15, %v553_v25 }
  0xc0   :  { %v554_v20 = vpop.f32.mrf.mxu2 }
  0xc1   :  { %v567_v21 = vpop.f32.mrf.mxu3 }
  0xc8   :  { %v604_v26 = vpop.f32.mrf.mxu2 }
  0xd0   :  { %v578_v29 = vpop.f32.mrf.mxu0  ;;  %v606_v33 = vpop.f32.mrf.mxu2 }
  0xd1   :  { %v591_v30 = vpop.f32.mrf.mxu1  ;;  %v579_v31 = vadd.f32 %v578_v29, %v566_v28 }
  0xd3   :  { %v592_v32 = vadd.f32 %v591_v30, %v579_v31 }
  0xd5   :  { %v605_v34 = vadd.f32 %v604_v26, %v592_v32 }
  0xd7   :  { %v608_v35 = vmax.f32 %v605_v34, 0.0 }
  0xd8   :  { %v580_v36 = vpop.f32.mrf.mxu0 }
  0xd9   :  { %v593_v37 = vpop.f32.mrf.mxu1  ;;  %v609_v38 = vpack.c.bf16 %v608_v35, %v608_v35 }
  0xdb   :  { %686 = vmatmul.bf16.vlgmr.msrb.gmra.mxu3 %v609_v38 }
 0x15e   :  { %v687_v42 = vpop.f32.mrf.mxu3 }
 0x15f   :  { %v688_v43 = vadd.f32 %v1128_v41, %v687_v42 }
 0x161   :  { %v691_v44 = vmax.f32 %v688_v43, 0.0 }
 0x163   :  { %v692_v45 = vpack.c.bf16 %v691_v44, %v691_v44 }
 0x165   :  { %769 = vmatmul.bf16.vlgmr.msra.gmra.mxu2 %v692_v45 }
 0x166   :  { %v689_v46 = vpop.f32.mrf.mxu3 }
 0x1e8   :  { %v770_v48 = vpop.f32.mrf.mxu2 }
 0x1e9   :  { %v771_v49 = vadd.f32 %v1129_v47, %v770_v48 }
 0x1eb   :  { %774 = vst [vmem:[#allocation10] sm:$0x3] %v771_v49 }
 0x1ec   :  { %785 = dma.vmem_to_hbm [thread:$0]  %s781_s25, 32, %s783_s28, [#allocation4]  }
 0x1f0   :  { %v772_v50 = vpop.f32.mrf.mxu2 }
 0x1f1   :  { %1256 = dma.done.wait [#allocation4], 32  }
 0x1f2   :  { %1257 = vsyncadd [#allocation4], 4294967264 }
 0x1f3   :  { %790 = vsyncpa [#allocation3], 1 }
 0x1f4   :  { %791 = vsyncpa [#allocation6], 1 }
 0x1f5   :  { %792 = vsyncpa [#allocation9], 1 }
 0x1f6   :  { %793 = vsyncpa [#allocation4], 1 }

</bundles_post_ra>
